<compile_context>
chip_gen: v7x
topology: tpu7x:2x2x1
jax: 0.10.0
libtpu: 0.0.40
codegen_flags: <defaults>
</compile_context>

<pallas_src>
import functools

import jax
import jax.numpy as jnp
from jax.experimental import pallas as pl
from jax.experimental.pallas import tpu as pltpu


def _layernorm_kernel(gain_ref, bias_ref, x_ref, o_ref, *, eps: float):
    # x_ref: (TILE_ROWS, D) block in VMEM; gain/bias: (1,) scalars in SMEM.
    x = x_ref[...].astype(jnp.float32)
    d = x.shape[-1]

    # Single pass: two independent cross-lane reductions (overlap on the XLUs).
    sum_x = jnp.sum(x, axis=-1, keepdims=True)            # (tr, 1)
    sum_xx = jnp.sum(x * x, axis=-1, keepdims=True)        # (tr, 1)

    mean = sum_x * jnp.float32(1.0 / d)
    # torch.std default: unbiased (divide by N-1), eps added to std.
    var = (sum_xx - sum_x * mean) * jnp.float32(1.0 / (d - 1))
    var = jnp.maximum(var, jnp.float32(0.0))               # guard cancellation
    std = jnp.sqrt(var)

    # Fold scalar gain into the per-row scale: one (tr,1) divide instead of a
    # full-tile divide + full-tile extra multiply.
    scale = gain_ref[0] / (std + jnp.float32(eps))          # (tr, 1)
    o_ref[...] = ((x - mean) * scale + bias_ref[0]).astype(o_ref.dtype)


def _choose_tile_rows(rows: int, d: int, bytes_per_elem: int = 4,
                      target_tile_bytes: int = 2 << 20, max_tr: int = 2048) -> int:
    """Pick a row tile: large enough to amortize per-step overhead, small
    enough that double-buffered in+out tiles fit comfortably in scoped VMEM
    on every generation (v7x has only 64 MiB physical)."""
    tr = (target_tile_bytes // max(1, d * bytes_per_elem)) // 8 * 8
    tr = max(8, min(max_tr, tr))
    # Ensure >= 2 grid steps when possible so v7x megacore can split the grid.
    if rows > 8:
        half = max(8, (((rows + 1) // 2 + 7) // 8) * 8)
        tr = min(tr, half)
    return tr


def layer_norm_pallas(x, gain, bias, eps: float = 1e-6):
    """x: (..., D). gain/bias: shape (1,) scalars (as in the torch module)."""
    orig_shape = x.shape
    d = orig_shape[-1]
    rows = 1
    for s in orig_shape[:-1]:
        rows *= s
    x2 = x.reshape(rows, d)

    tr = _choose_tile_rows(rows, d)
    rows_padded = pl.cdiv(rows, tr) * tr
    if rows_padded != rows:
        # Pad rows to keep the pipeline intact (padded rows are normalized
        # independently and sliced off afterwards — no NaNs: zero rows give
        # std=0 -> y = bias).
        x2 = jnp.pad(x2, ((0, rows_padded - rows), (0, 0)))

    grid = (rows_padded // tr,)

    out = pl.pallas_call(
        functools.partial(_layernorm_kernel, eps=eps),
        out_shape=jax.ShapeDtypeStruct((rows_padded, d), x.dtype),
        grid_spec=pltpu.PrefetchScalarGridSpec(
            num_scalar_prefetch=0,
            grid=grid,
            in_specs=[
                pl.BlockSpec(memory_space=pltpu.MemorySpace.SMEM),  # gain (1,)
                pl.BlockSpec(memory_space=pltpu.MemorySpace.SMEM),  # bias (1,)
                pl.BlockSpec((tr, d), lambda i: (i, 0)),            # x tile
            ],
            out_specs=pl.BlockSpec((tr, d), lambda i: (i, 0)),
        ),
        compiler_params=pltpu.CompilerParams(
            dimension_semantics=("parallel",),
            vmem_limit_bytes=32 * 1024 * 1024,
        ),
    )(gain, bias, x2)

    if rows_padded != rows:
        out = out[:rows]
    return out.reshape(orig_shape)


def encoder_forward(x, mask, layers, gain, bias, eps: float = 1e-6):
    """Mirrors Encoder.forward: apply each layer(x, mask), then LayerNormalization."""
    for layer in layers:
        x = layer(x, mask)
    return layer_norm_pallas(x, gain, bias, eps)


def _reference_layernorm(x, gain, bias, eps=1e-6):
    mean = jnp.mean(x, axis=-1, keepdims=True)
    var = jnp.sum((x - mean) ** 2, axis=-1, keepdims=True) / (x.shape[-1] - 1)
    std = jnp.sqrt(var)
    return (x - mean) / (std + eps) * gain[0] + bias[0]


if __name__ == "__main__":
    key = jax.random.PRNGKey(0)
    kx, km, kx2 = jax.random.split(key, 3)

    # Small shapes implied by a transformer encoder forward: (batch, seq, d_model)
    B, S, D = 2, 8, 32
    x = jax.random.normal(kx, (B, S, D), dtype=jnp.float32)
    mask = (jax.random.uniform(km, (B, 1, S, S)) > 0.1).astype(jnp.float32)

    # Deterministic parameter init matching nn.Parameter(torch.ones(1)/zeros(1))
    gain = jnp.ones((1,), dtype=jnp.float32)
    bias = jnp.zeros((1,), dtype=jnp.float32)

    layers = ()  # injected layer stack (see TODO above)

    out = encoder_forward(x, mask, layers, gain, bias)
    out = jax.block_until_ready(out)
    ref = _reference_layernorm(x, gain, bias)
    assert out.shape == x.shape and out.dtype == x.dtype
    assert jnp.max(jnp.abs(out - ref)) < 1e-5

    # Second shape exercising the row-padding path (rows not a tile multiple).
    x_odd = jax.random.normal(kx2, (3, 5, D), dtype=jnp.float32)
    out_odd = jax.block_until_ready(layer_norm_pallas(x_odd, gain, bias))
    ref_odd = _reference_layernorm(x_odd, gain, bias)
    assert out_odd.shape == x_odd.shape
    assert jnp.max(jnp.abs(out_odd - ref_odd)) < 1e-5

    print("KERNEL_OK")
</pallas_src>

<mosaic_0001>
module attributes {stable_mosaic.version = 11 : i64} {
  func.func @_layernorm_kernel(%arg0: i32, %arg1: memref<1xf32, #tpu.memory_space<smem>>, %arg2: memref<1xf32, #tpu.memory_space<smem>>, %arg3: memref<8x32xf32, #tpu.memory_space<vmem>>, %arg4: memref<8x32xf32, #tpu.memory_space<vmem>>) attributes {dimension_semantics = [#tpu.dimension_semantics<parallel>], iteration_bounds = array<i64: 2>, scalar_prefetch = 0 : i64, scratch_operands = 0 : i64, tpu.core_type = #tpu.core_type<tc>, window_params = [{transform_indices = @transform_0, window_bounds = array<i64: 1>}, {transform_indices = @transform_1, window_bounds = array<i64: 1>}, {transform_indices = @transform_2, window_bounds = array<i64: 8, 32>}, {transform_indices = @transform_3, window_bounds = array<i64: 8, 32>}]} {
    %c0 = arith.constant 0 : index
    %c0_0 = arith.constant 0 : index
    %0 = vector.load %arg3[%c0, %c0_0] : memref<8x32xf32, #tpu.memory_space<vmem>>, vector<8x32xf32>
    %cst = arith.constant dense<0.000000e+00> : vector<8xf32>
    %1 = vector.multi_reduction <add>, %0, %cst [1] : vector<8x32xf32> to vector<8xf32>
    %2 = vector.shape_cast %1 : vector<8xf32> to vector<8x1xf32>
    %3 = arith.mulf %0, %0 : vector<8x32xf32>
    %cst_1 = arith.constant dense<0.000000e+00> : vector<8xf32>
    %4 = vector.multi_reduction <add>, %3, %cst_1 [1] : vector<8x32xf32> to vector<8xf32>
    %5 = vector.shape_cast %4 : vector<8xf32> to vector<8x1xf32>
    %cst_2 = arith.constant 3.125000e-02 : f32
    %6 = vector.broadcast %cst_2 : f32 to vector<8x1xf32>
    %7 = arith.mulf %2, %6 : vector<8x1xf32>
    %8 = arith.mulf %2, %7 : vector<8x1xf32>
    %9 = arith.subf %5, %8 : vector<8x1xf32>
    %cst_3 = arith.constant 0.0322580636 : f32
    %10 = vector.broadcast %cst_3 : f32 to vector<8x1xf32>
    %11 = arith.mulf %9, %10 : vector<8x1xf32>
    %cst_4 = arith.constant 0.000000e+00 : f32
    %12 = vector.broadcast %cst_4 : f32 to vector<8x1xf32>
    %13 = arith.maximumf %11, %12 : vector<8x1xf32>
    %14 = math.sqrt %13 : vector<8x1xf32>
    %c0_5 = arith.constant 0 : index
    %15 = memref.load %arg1[%c0_5] : memref<1xf32, #tpu.memory_space<smem>>
    %cst_6 = arith.constant 9.99999997E-7 : f32
    %16 = vector.broadcast %cst_6 : f32 to vector<8x1xf32>
    %17 = arith.addf %14, %16 : vector<8x1xf32>
    %18 = vector.broadcast %15 : f32 to vector<8x1xf32>
    %19 = arith.divf %18, %17 : vector<8x1xf32>
    %20 = vector.broadcast %7 : vector<8x1xf32> to vector<8x32xf32>
    %21 = arith.subf %0, %20 : vector<8x32xf32>
    %22 = vector.broadcast %19 : vector<8x1xf32> to vector<8x32xf32>
    %23 = arith.mulf %21, %22 : vector<8x32xf32>
    %c0_7 = arith.constant 0 : index
    %24 = memref.load %arg2[%c0_7] : memref<1xf32, #tpu.memory_space<smem>>
    %25 = vector.broadcast %24 : f32 to vector<8x32xf32>
    %26 = arith.addf %23, %25 : vector<8x32xf32>
    %c0_8 = arith.constant 0 : index
    %c0_9 = arith.constant 0 : index
    %27 = vector.load %arg4[%c0_8, %c0_9] : memref<8x32xf32, #tpu.memory_space<vmem>>, vector<8x32xf32>
    tpu.vector_store %arg4[%c0_8, %c0_9], %26 {strides = array<i32>} : memref<8x32xf32, #tpu.memory_space<vmem>>, vector<8x32xf32>,
    return
  }
  func.func @transform_0(%arg0: i32) -> i32 {
    %c0_i32 = arith.constant 0 : i32
    %c0_i32_0 = arith.constant 0 : i32
    return %c0_i32 : i32
  }
  func.func @transform_1(%arg0: i32) -> i32 {
    %c0_i32 = arith.constant 0 : i32
    %c0_i32_0 = arith.constant 0 : i32
    return %c0_i32 : i32
  }
  func.func @transform_2(%arg0: i32) -> (i32, i32) {
    %c0_i32 = arith.constant 0 : i32
    %c0_i32_0 = arith.constant 0 : i32
    return %arg0, %c0_i32 : i32, i32
  }
  func.func @transform_3(%arg0: i32) -> (i32, i32) {
    %c0_i32 = arith.constant 0 : i32
    %c0_i32_0 = arith.constant 0 : i32
    return %arg0, %c0_i32 : i32, i32
  }
}

</mosaic_0001>

<bundles_post_ra>
// kernel: tpu_custom_call.1
= control target key start
LH: loop header
LB: loop body
LE: loop exit
PB: predicated region body
PF: predicated region fallthrough
CT: control target
= control target key end

     0   :  { %s660_s0 = inlined_call_operand.<no memory space> [shape: f32[1], index: 0, kind: input, shape index: {}]   ;;  %s661_s1 = inlined_call_operand.<no memory space> [shape: f32[1], index: 1, kind: input, shape index: {}]   ;;  %s662_s2 = inlined_call_operand.hbm [shape: f32[16,32], index: 2, kind: input, shape index: {}]   ;;  %s663_s3 = inlined_call_operand.hbm [shape: f32[16,32], index: 3, kind: output, shape index: {}]  }
   0x1   :  { %8 = sst [smem:[#allocation2]] %s660_s0 }
   0x2   :  { %9 = sst [smem:[#allocation3]] %s661_s1 }
   0x3   :  { %10 = vsyncpa [#allocation5], 0 }
   0x4   :  { %12 = vsyncpa [#allocation5 + $0x1], 0 }
   0x5   :  { %13 = vsyncpa [#allocation6], 0 }
   0x6   :  { %15 = vsyncpa [#allocation6 + $0x1], 0  ;;  %s492_s16 = smov 0   ;;  %s494_s17 = smov 0  }
   0x7   :  { %s496_s18 = smov 0   ;;  %s498_s19 = smov 0  }
   0x8 LB: > { %s513_s0 = sadd.s32 4294967295, %s462_s19   ;;  %s304_s1 = sadd.s32 4294967294, %s462_s19   ;;  %s462_s19 = sphi %s498_s19, %s678_s19   ;;  %s458_s18 = sphi %s496_s18, %s677_s18   ;;  %s454_s17 = sphi %s494_s17, %s676_s17   ;;  %s450_s16 = sphi %s492_s16, %s675_s16  }
   0x9   : > { %s517_s20 = sadd.s32 1, %s462_s19   ;;  %s70_s21 = sadd.s32 1, %s458_s18 }
   0xa   : > { %s67_s22 = ssub.s32 %s462_s19, %s517_s20  ;;  %p77_p0 = scmp.ne.s32.totalorder %s458_s18, %s454_s17 }
   0xb   : > { %p68_p1 = scmp.eq.s32.totalorder %s67_s22, 0  ;;  %p78_p2 = scmp.eq.s32.totalorder %s462_s19, 0 }
   0xc   : > { %p83_p3 = scmp.ne.s32.totalorder %s454_s17, %s450_s16  ;;  %p84_p4 = scmp.eq.s32.totalorder %s513_s0, 0 }
   0xd   : > { %s529_s23 = scalar_select %p68_p1, %s458_s18, %s70_s21  }
   0xe   : > { %p531_p5 = por %p78_p2, %p77_p0  ;;  %p535_p6 = por %p84_p4, %p83_p3 }
   0xf   : > { %p107_p7 = scmp.eq.s32.totalorder %s513_s0, 1  ;;  %p113_p8 = scmp.eq.s32.totalorder %s304_s1, 1 }
  0x10   : > { %p328_p10 = scmp.lt.s32.totalorder %s462_s19, 2  ;;  %s139_s28 = sand.u32 1, %s458_s18  }
  0x11   : > { %p542_p11 = por %p107_p7, %p77_p0  ;;  %p546_p12 = por %p113_p8, %p83_p3 }
  0x12   : > { %s308_s29 = sshll.u32 %s462_s19, 7  ;;  %s307_s30 = sshll.u32 %s139_s28, 3 }
  0x13   : > { %s667_s26 = scalar_select %p542_p11, 1, 0 }
  0x14   : > { %s668_s27 = scalar_select %p546_p12, 1, 0 }
  0x15   : > { %s555_s6 = scalar_lea.hbm %s662_s2, %s308_s29  ;;  %s143_s7 = scalar_lea.vmem [#allocation4], %s307_s30 }
  0x16   : > { %s150_s8 = sshll.u32 %s143_s7, 4  ;;  %p559_p13 = pnand %p328_p10, %p531_p5  ;;  %s563_s8 = int_to_ptr.vmem [resolvable:$true] %s150_s8 }
  0x17   : > { %s140_s10 = scalar_lea.sflag [#allocation5], %s139_s28  ;;  %s366_s11 = scalar_lea.hbm %s555_s6, 128 }
  0x18   : > { %p367_p2 = scmp.ne.s32.totalorder %s555_s6, %s366_s11  ;;  %p368_p3 = pneg %p559_p13 }
  0x19   : > { %s371_s14 = scalar_lea.hbm %s662_s2, 256  ;;  %p372_p5 = scmp.lt.u32.totalorder %s555_s6, %s662_s2 }
  0x1a   : > { %p369_p4 = pnand %p368_p3, %p367_p2  ;;  %p373_p8 = scmp.lt.u32.totalorder %s371_s14, %s366_s11 }
  0x1b   : > { %p375_p9 = scmp.lt.u32.totalorder %s366_s11, %s555_s6 }
  0x1c   : > { %p370_p7 = pneg %p369_p4  ;;  %p374_p10 = por %p373_p8, %p372_p5 }
  0x1e   : > { %p376_p0 = por %p375_p9, %p374_p10 }
  0x20   : > { %p377_p1 = pnand %p376_p0, %p370_p7 }
  0x22   : > { %380 = shalt.err (!%p377_p1)
}
  0x23   : > { %s381_s21 = scalar_lea.vmem %s563_s8, 128  ;;  %s464_s22 = smov [#allocation4]  }
  0x24   : > { %p382_p2 = scmp.ne.s32.totalorder %s563_s8, %s381_s21  ;;  %s386_s24 = sshll.u32 %s464_s22, 4  ;;  %s387_s24 = int_to_ptr.vmem [resolvable:$false] %s386_s24 }
  0x25   : > { %s388_s28 = scalar_lea.vmem %s387_s24, 256  ;;  %p389_p11 = scmp.lt.s32.totalorder %s563_s8, %s387_s24 }
  0x26   : > { %p384_p4 = pnand %p382_p2, %p368_p3  ;;  %p390_p5 = scmp.lt.s32.totalorder %s388_s28, %s381_s21 }
  0x28   : > { %p385_p12 = pneg %p384_p4  ;;  %p391_p8 = por %p390_p5, %p389_p11 }
  0x2a   : > { %p392_p9 = pnand %p391_p8, %p385_p12 }
  0x2c   : > { %395 = shalt.err (!%p392_p9)
}
  0x2d   : > { %323 = dma.hbm_to_vmem [thread:$0]  (!%p559_p13), %s555_s6, 128, %s563_s8, %s140_s10  }
  0x2e   : > { %p670_p0 = scmp.lt.s32.totalorder %s462_s19, 3  ;;  %p671_p1 = scmp.ge.s32.totalorder %s462_s19, 1 }
  0x30   : > { %p156_p3 = pnand %p671_p1, %p670_p0 }
  0x31   : > { %s597_s29 = sand.u32 (!%p156_p3), 1, %s454_s17  }
  0x32   : > { %159 = sbr.rel (%p156_p3) target bundleno = 260 (0x104), region = 32  ;;  %s310_s30 = sshll.u32 (!%p156_p3), %s597_s29, 3 }
  0x33   : > { %s162_s4 = scalar_lea.sflag (!%p156_p3), [#allocation5], %s597_s29  ;;  %s165_s5 = scalar_lea.vmem (!%p156_p3), [#allocation4], %s310_s30 }
  0x39   : > { %441 = dma.done.wait (%p535_p6), %s162_s4, 128  }
  0x3a   : > { %443 = vsyncadd (%p535_p6), %s162_s4, 4294967168  ;;  %vm189_vm0 = vcmask 261120   ;;  %v188_v0 = vld [vmem:[%s165_s5] sm:$0xff]  ;;  %s209_s25 = sld [smem:[#allocation2]]  ;;  %s313_s7 = sshll.u32 %s513_s0, 7 }
  0x3b   : > { %v190_v1 = vsel %vm189_vm0, %v188_v0, 0.0  ;;  %v193_v2 = vmul.f32 %v188_v0, %v188_v0  ;;  %s216_s6 = sld [smem:[#allocation3]]  ;;  %s187_s8 = scalar_lea.vmem [#allocation7], %s310_s30 }
  0x3c   : > { %191 = vadd.xlane.f32.xlu0 %v190_v1  ;;  %s234_s9 = sshll.u32 %s187_s8, 4  ;;  %s615_s12 = scalar_lea.hbm %s663_s3, %s313_s7  ;;  %s617_s9 = int_to_ptr.vmem [resolvable:$true] %s234_s9 }
  0x3d   : > { %v194_v3 = vsel %vm189_vm0, %v193_v2, 0.0  ;;  %s221_s13 = scalar_lea.sflag [#allocation6], %s597_s29  ;;  %s396_s14 = scalar_lea.vmem %s617_s9, 128 }
  0x3e   : > { %p397_p6 = scmp.ne.s32.totalorder %s617_s9, %s396_s14  ;;  %p672_p11 = scmp.ne.s32.totalorder %s667_s26, 0 }
  0x3f   : > { %s465_s0 = smov [#allocation7]  }
  0x40   : > { %195 = vadd.xlane.f32.xlu0 %v194_v3  ;;  %v211_v17 = vstv %s209_s25  ;;  %p398_p12 = pnand %p397_p6, %p672_p11  ;;  %s400_s15 = sshll.u32 %s465_s0, 4  ;;  %s401_s15 = int_to_ptr.vmem [resolvable:$false] %s400_s15 }
  0x41   : > { %v217_v21 = vstv %s216_s6  ;;  %s402_s1 = scalar_lea.vmem %s401_s15, 256  ;;  %p403_p7 = scmp.lt.s32.totalorder %s617_s9, %s401_s15 }
  0x42   : > { %p399_p13 = pneg %p398_p12  ;;  %p404_p10 = scmp.lt.s32.totalorder %s402_s1, %s396_s14 }
  0x44   : > { %p405_p2 = por %p404_p10, %p403_p7 }
  0x46   : > { %p406_p4 = pnand %p405_p2, %p399_p13 }
  0xc9   : > { %v192_v4 = vpop.xlane.xlu0 %191 }
  0xca   : > { %v197_v5 = vmul.f32 0.03125, %v192_v4 }
  0xcc   : > { %v198_v6 = vmul.f32 %v197_v5, %v192_v4  ;;  %v214_v19 = vsub.f32 %v188_v0, %v197_v5 }
  0xcd   : > { %v196_v7 = vpop.xlane.xlu0 %195 }
  0xce   : > { %v199_v8 = vsub.f32 %v196_v7, %v198_v6 }
  0xd0   : > { %v200_v9 = vmul.f32 0.032258064, %v199_v8 }
  0xd2   : > { %v201_v10 = vmax.f32 %v200_v9, 0.0 }
  0xd4   : > { %362 = vrsqrt.f32 %v201_v10  ;;  %vm204_vm1 = vcmp.eq.f32.partialorder %v201_v10, inf  ;;  %v207_v13 = vand.u32 2147483648, %v201_v10  ;;  %vm206_vm2 = vcmp.eq.f32.partialorder %v201_v10, 0.0 }
  0xde   : > { %v363_v11 = vpop.eup %362 }
  0xdf   : > { %v203_v12 = vmul.f32 %v363_v11, %v201_v10 }
  0xe1   : > { %v205_v14 = vsel %vm204_vm1, %v201_v10, %v203_v12 }
  0xe2   : > { %v208_v15 = vsel %vm206_vm2, %v207_v13, %v205_v14 }
  0xe3   : > { %v210_v16 = vadd.f32 1e-06, %v208_v15 }
  0xe5   : > { %364 = vrcp.f32 %v210_v16 }
  0xef   : > { %v365_v18 = vpop.eup %364 }
  0xf0   : > { %v213_v20 = vmul.f32 %v365_v18, %v211_v17 }
  0xf2   : > { %v215_v22 = vmul.f32 %v214_v19, %v213_v20 }
  0xf4   : > { %v218_v23 = vadd.f32 %v217_v21, %v215_v22 }
  0xf6   : > { %219 = vst.msk [vmem:[%s187_s8] sm:$0xff] %vm189_vm0, %v218_v23 }
  0xf7   : > { %409 = shalt.err (!%p406_p4)
}
  0xf8   : > { %s410_s21 = scalar_lea.hbm %s615_s12, 128  ;;  %s414_s28 = scalar_lea.hbm %s663_s3, 256 }
  0xf9   : > { %p411_p5 = scmp.ne.s32.totalorder %s615_s12, %s410_s21  ;;  %p415_p0 = scmp.lt.u32.totalorder %s615_s12, %s663_s3 }
  0xfa   : > { %p416_p1 = scmp.lt.u32.totalorder %s414_s28, %s410_s21  ;;  %p418_p6 = scmp.lt.u32.totalorder %s410_s21, %s615_s12 }
  0xfb   : > { %p412_p8 = pnand %p411_p5, %p672_p11 }
  0xfc   : > { %p417_p3 = por %p416_p1, %p415_p0 }
  0xfd   : > { %p413_p9 = pneg %p412_p8 }
  0xfe   : > { %p419_p12 = por %p418_p6, %p417_p3 }
 0x100   : > { %p420_p13 = pnand %p419_p12, %p413_p9 }
 0x102   : > { %423 = shalt.err (!%p420_p13)
}
 0x103   : > { %318 = dma.vmem_to_hbm [thread:$0]  (%p672_p11), %s617_s9, 128, %s615_s12, %s221_s13  }
 0x104 PF: > { %s246_s4 = sand.u32 1, %s450_s16   ;;  %p673_p7 = scmp.ne.s32.totalorder %s668_s27, 0 }
 0x105   : > { %p674_p10 = scmp.ge.s32.totalorder %s462_s19, 2  ;;  %s247_s5 = scalar_lea.sflag [#allocation6], %s246_s4 }
 0x107   : > { %p325_p2 = pnand %p674_p10, %p673_p7 }
 0x109   : > { %445 = dma.done.wait (!%p325_p2), %s247_s5, 128  }
 0x10a   : > { %447 = vsyncadd (!%p325_p2), %s247_s5, 4294967168  ;;  %p18_p4 = scmp.ge.s32.totalorder %s517_s20, 4   ;;  %s675_s16 = smov %s454_s17 }
 0x10b   : > { %s676_s17 = smov %s458_s18  ;;  %s677_s18 = smov %s529_s23 }
 0x10c   : > { %s678_s19 = smov %s517_s20  ;;  %20 = sbr.rel (!%p18_p4) target bundleno = 8 (0x8), region = 77 }
 0x113   :  { %252 = vsyncpa [#allocation5], 1 }
 0x114   :  { %254 = vsyncpa [#allocation5 + $0x1], 1 }
 0x115   :  { %255 = vsyncpa [#allocation6], 1 }
 0x116   :  { %257 = vsyncpa [#allocation6 + $0x1], 1 }

</bundles_post_ra>
